<compile_context>
chip_gen: v6e
topology: v6e:2x2x1
jax: 0.10.0
libtpu: 0.0.40
codegen_flags: <defaults>
</compile_context>

<pallas_src>
import math
from functools import partial

import jax
import jax.numpy as jnp
from jax.experimental import pallas as pl
from jax.experimental.pallas import tpu as pltpu


def _round_up(n, m):
    return ((n + m - 1) // m) * m


def _vmem_capacity_bytes():
    try:
        return int(getattr(pltpu.get_tpu_info(), "vmem_capacity_bytes", 64 << 20))
    except Exception:
        return 64 << 20  # conservative default (v7x per-TC physical VMEM)


def _batch_dim_semantics():
    """Batch grid axis semantics: shard across both TensorCores on v7x."""
    try:
        kind = jax.devices()[0].device_kind.lower()
    except Exception:
        kind = ""
    if "v7" in kind:
        # TODO(synk): confirm CORE_PARALLEL sharding of ragged batch grids on real v7x.
        return (getattr(pltpu, "CORE_PARALLEL", "parallel"),)
    return ("parallel",)


# ---------------------------------------------------------------------------
# Packed path (D <= 128): k rows share a 128-lane vreg row; reductions + W1/W2
# are block-structured MXU matmuls.
# ---------------------------------------------------------------------------
def _packed_kernel(xp_ref, w1_ref, b1_ref, w2_ref, b2_ref, y_ref, *, use_x_block):
    f32 = jnp.float32
    xp = xp_ref[...]                                    # [tp, 128], lane-dense
    ang = xp * f32(math.pi)
    # Segment means + hidden1 fused into block-structured MXU matmuls; the
    # VPU/EUP only do the fully lane-dense sin/cos.
    h = jnp.dot(jnp.cos(ang), w1_ref[0:128, :], preferred_element_type=f32)
    h = h + jnp.dot(jnp.sin(ang), w1_ref[128:256, :], preferred_element_type=f32)
    if use_x_block:                                     # 2-D branch: per-row mean term
        h = h + jnp.dot(xp, w1_ref[256:384, :], preferred_element_type=f32)
    h = jnp.maximum(h + b1_ref[...], f32(0.0))          # [tp, KHp] (ReLU)
    # Block-diagonal predict layer, packed output (k*O lanes per packed row).
    y_ref[...] = jnp.dot(h, w2_ref[...], preferred_element_type=f32) + b2_ref[...]


def _pick_packed_tile(R, KHp, KO):
    budget = _vmem_capacity_bytes() // 4
    per_row = 4 * (2 * 128        # x tile (double-buffered)
                   + 2 * 128      # cos/sin temporaries
                   + KHp          # hidden activations
                   + 2 * KO)      # y tile (double-buffered)
    tp = budget // max(per_row, 1)
    tp = max(8, min(tp, 4096))                  # 4096 packed rows = up to 512K elems
    tp = min(tp, _round_up(R, 8))
    return int(max(8, (tp // 8) * 8))


def _forward_packed(x2, D, w_cos, w_sin, w_mean_or_none, b1_eff, w2, b2, block_rows):
    B = x2.shape[0]
    H = w_cos.shape[0]
    O = w2.shape[1]

    Dp = max(1, pl.next_power_of_2(D))          # segment width dividing 128
    k = 128 // Dp                               # rows packed per vreg row
    use_x_block = w_mean_or_none is not None
    n_blocks = 3 if use_x_block else 2

    # Pad to a multiple of 8*k rows (<= 8*k-1 zero rows) and lane-pad D -> Dp.
    # This fuses into the packing reshape below — no separate full HBM pass and
    # no per-tile padding of the batch.
    Bk = _round_up(B, 8 * k)
    if Bk != B or Dp != D:
        x2 = jnp.pad(x2, ((0, Bk - B), (0, Dp - D)))
    R = Bk // k
    xp = x2.reshape(R, 128)                     # lane-dense packed view of x

    # --- fused block-structured weights (tiny, built once on the host side) ---
    lanes = jnp.arange(128)
    seg = ((lanes[:, None] // Dp == jnp.arange(k)[None, :]) &
           ((lanes[:, None] % Dp) < D)).astype(jnp.float32)           # [128, k]
    inv_d = jnp.float32(1.0 / D)
    blocks = [jnp.kron(seg, (w_cos * inv_d)[None, :]),
              jnp.kron(seg, (w_sin * inv_d)[None, :])]
    if use_x_block:
        blocks.append(jnp.kron(seg, (w_mean_or_none * inv_d)[None, :]))
    w1big = jnp.concatenate(blocks, axis=0)                            # [n*128, k*H]
    b1big = jnp.tile(b1_eff[None, :], (1, k))                          # [1, k*H]
    w2big = jnp.kron(jnp.eye(k, dtype=jnp.float32), w2)                # [k*H, k*O]
    b2big = jnp.tile(b2[None, :], (1, k))                              # [1, k*O]

    KH, KO = k * H, k * O
    KHp = _round_up(KH, 128)                    # lane-dense hidden activations
    if KHp != KH:
        w1big = jnp.pad(w1big, ((0, 0), (0, KHp - KH)))
        b1big = jnp.pad(b1big, ((0, 0), (0, KHp - KH)))
        w2big = jnp.pad(w2big, ((0, KHp - KH), (0, 0)))

    tp = block_rows if block_rows is not None else _pick_packed_tile(R, KHp, KO)
    tp = max(8, (int(tp) // 8) * 8)
    grid = (pl.cdiv(R, tp),)                    # ragged last tile: OOB writes dropped

    tile_bytes = 4 * tp * (2 * 128 + 2 * 128 + KHp + 2 * KO)
    w_bytes = 4 * (n_blocks * 128 * KHp + KHp + KHp * KO + KO)
    vmem_limit = int(min(_vmem_capacity_bytes(),
                         2 * (tile_bytes + w_bytes) + (8 << 20)))

    cost = pl.CostEstimate(
        flops=int(R * (2 * n_blocks * 128 * KHp + 2 * KHp * KO)),
        transcendentals=int(2 * R * 128),
        bytes_accessed=int(4 * (R * 128 + R * KO) + w_bytes),
    )

    const = lambda i: (0, 0)
    yp = pl.pallas_call(
        partial(_packed_kernel, use_x_block=use_x_block),
        out_shape=jax.ShapeDtypeStruct((R, KO), jnp.float32),
        grid=grid,
        in_specs=[
            pl.BlockSpec((tp, 128), lambda i: (i, 0)),      # packed x, tiled over batch
            pl.BlockSpec((n_blocks * 128, KHp), const),     # fused W1 (resident)
            pl.BlockSpec((1, KHp), const),                  # fused b1
            pl.BlockSpec((KHp, KO), const),                 # block-diag W2 (resident)
            pl.BlockSpec((1, KO), const),                   # fused b2
        ],
        out_specs=pl.BlockSpec((tp, KO), lambda i: (i, 0)),
        compiler_params=pltpu.CompilerParams(
            dimension_semantics=_batch_dim_semantics(),
            vmem_limit_bytes=vmem_limit,
        ),
        cost_estimate=cost,
    )(xp, w1big, b1big, w2big, b2big)

    # Row-major unpack of the packed output; the [:B] slice is a cheap view.
    return yp.reshape(Bk, O)[:B]


# ---------------------------------------------------------------------------
# Wide fallback (D > 128): rows already fill vregs; per-row reductions on the
# VPU/XLU, predict layer on the MXU.
# ---------------------------------------------------------------------------
def _wide_kernel(x_ref, w1s_ref, b1_ref, w2_ref, b2_ref, y_ref):
    f32 = jnp.float32
    x = x_ref[...]                                      # [tb, D]
    ang = x * f32(math.pi)
    cos_m = jnp.mean(jnp.cos(ang), axis=-1, keepdims=True)
    sin_m = jnp.mean(jnp.sin(ang), axis=-1, keepdims=True)
    x_m = jnp.mean(x, axis=-1, keepdims=True)
    w1s = w1s_ref[...]                                  # [3, H]: cos / sin / mean rows
    h = cos_m * w1s[0:1, :] + sin_m * w1s[1:2, :] + x_m * w1s[2:3, :] + b1_ref[...]
    h = jnp.maximum(h, f32(0.0))
    y_ref[...] = jnp.dot(h, w2_ref[...], preferred_element_type=f32) + b2_ref[...]


def _pick_wide_tile(B, D, H, O):
    budget = _vmem_capacity_bytes() // 4
    per_row = 4 * (2 * D + 2 * D + H + 2 * O)
    tb = budget // max(per_row, 1)
    tb = max(8, min(tb, 65536))
    tb = min(tb, _round_up(B, 8))
    return int(max(8, (tb // 8) * 8))


def _forward_wide(x2, w_cos, w_sin, w_mean, b1_eff, w2, b2, block_rows):
    B, D = x2.shape
    H = w_cos.shape[0]
    O = w2.shape[1]
    w1s = jnp.stack([w_cos, w_sin, w_mean], axis=0)     # [3, H]
    b1r = b1_eff[None, :]
    b2r = b2[None, :]

    tb = block_rows if block_rows is not None else _pick_wide_tile(B, D, H, O)
    tb = max(8, (int(tb) // 8) * 8)
    grid = (pl.cdiv(B, tb),)

    tile_bytes = 4 * tb * (2 * D + 2 * D + H + 2 * O)
    w_bytes = 4 * (3 * H + H + H * O + O)
    vmem_limit = int(min(_vmem_capacity_bytes(),
                         2 * (tile_bytes + w_bytes) + (8 << 20)))
    cost = pl.CostEstimate(
        flops=int(B * (6 * D + 8 * H + 2 * H * O)),
        transcendentals=int(2 * B * D),
        bytes_accessed=int(4 * (B * D + B * O) + w_bytes),
    )

    const = lambda i: (0, 0)
    return pl.pallas_call(
        _wide_kernel,
        out_shape=jax.ShapeDtypeStruct((B, O), jnp.float32),
        grid=grid,
        in_specs=[
            pl.BlockSpec((tb, D), lambda i: (i, 0)),
            pl.BlockSpec((3, H), const),
            pl.BlockSpec((1, H), const),
            pl.BlockSpec((H, O), const),
            pl.BlockSpec((1, O), const),
        ],
        out_specs=pl.BlockSpec((tb, O), lambda i: (i, 0)),
        compiler_params=pltpu.CompilerParams(
            dimension_semantics=_batch_dim_semantics(),
            vmem_limit_bytes=vmem_limit,
        ),
        cost_estimate=cost,
    )(x2, w1s, b1r, w2, b2r)


# ---------------------------------------------------------------------------
# Public wrapper
# ---------------------------------------------------------------------------
def mlp_treatnet_forward(x, w1, b1, w2, b2, *, block_rows=None):
    """MLP_treatnet forward.  w1:[num_in,H], b1:[H], w2:[H,O], b2:[O]
    (weights stored transposed w.r.t. torch.nn.Linear.weight)."""
    x = jnp.asarray(x, jnp.float32)
    w1 = jnp.asarray(w1, jnp.float32)
    b1 = jnp.asarray(b1, jnp.float32).reshape(-1)
    w2 = jnp.asarray(w2, jnp.float32)
    b2 = jnp.asarray(b2, jnp.float32).reshape(-1)

    num_in, H = w1.shape
    if num_in < 3:
        raise ValueError("forward writes x_mix[:, 2]; requires num_in >= 3")

    # Columns of x_mix actually used: col 1 -> cos, col 2 -> sin (unless it is
    # the last column, which the mean assignment overwrites), col -1 -> mean.
    w_cos = w1[1]
    w_sin = w1[2] if num_in >= 4 else jnp.zeros((H,), jnp.float32)
    w_mean = w1[num_in - 1]

    if x.ndim == 1:
        # torch 1-D branch: global mean of x, broadcast to every row -> fold it
        # into the bias (no scalar VMEM operand, no in-kernel broadcast).
        gm = jnp.mean(x)
        b1_eff = b1 + gm * w_mean
        x2 = x[:, None]
        D = 1
        w_mean_blk = None                      # per-row mean block unused
    elif x.ndim == 2:
        b1_eff = b1
        x2 = x
        D = x.shape[1]
        w_mean_blk = w_mean
    else:
        raise ValueError("MLP_treatnet forward expects a 1-D or 2-D input")

    if D > 128:
        return _forward_wide(x2, w_cos, w_sin, w_mean, b1_eff, w2, b2, block_rows)
    return _forward_packed(x2, D, w_cos, w_sin, w_mean_blk, b1_eff, w2, b2, block_rows)


# ---------------------------------------------------------------------------
# Params + pure-JAX reference (faithful replica of the PyTorch forward)
# ---------------------------------------------------------------------------
def make_params(key, num_out, n_hidden=10, num_in=4):
    k1, k2, k3, k4 = jax.random.split(key, 4)
    bound1 = 1.0 / math.sqrt(num_in)
    bound2 = 1.0 / math.sqrt(n_hidden)
    w1 = jax.random.uniform(k1, (num_in, n_hidden), jnp.float32, -bound1, bound1)
    b1 = jax.random.uniform(k2, (1, n_hidden), jnp.float32, -bound1, bound1)
    w2 = jax.random.uniform(k3, (n_hidden, num_out), jnp.float32, -bound2, bound2)
    b2 = jax.random.uniform(k4, (1, num_out), jnp.float32, -bound2, bound2)
    return w1, b1, w2, b2


def reference_forward(x, w1, b1, w2, b2):
    x = jnp.asarray(x, jnp.float32)
    w1 = jnp.asarray(w1, jnp.float32)
    b1 = jnp.asarray(b1, jnp.float32).reshape(1, -1)
    w2 = jnp.asarray(w2, jnp.float32)
    b2 = jnp.asarray(b2, jnp.float32).reshape(1, -1)
    num_in = w1.shape[0]
    B = x.shape[0]
    x_mix = jnp.zeros((B, num_in), jnp.float32)
    if x.ndim == 2:
        x_mix = x_mix.at[:, 1].set(jnp.mean(jnp.cos(x * math.pi), axis=-1))
        x_mix = x_mix.at[:, 2].set(jnp.mean(jnp.sin(x * math.pi), axis=-1))
    else:
        x_mix = x_mix.at[:, 1].set(jnp.cos(x * math.pi))
        x_mix = x_mix.at[:, 2].set(jnp.sin(x * math.pi))
    x_mix = x_mix.at[:, -1].set(jnp.mean(x, axis=-1))   # scalar broadcast for 1-D x
    h = jnp.maximum(x_mix @ w1 + b1, 0.0)
    return h @ w2 + b2


if __name__ == "__main__":
    key = jax.random.PRNGKey(0)
    k_x, k_x1, k_xw, k_p = jax.random.split(key, 4)
    num_out, n_hidden = 3, 10
    w1, b1, w2, b2 = make_params(k_p, num_out=num_out, n_hidden=n_hidden)

    # 2-D branch (packed path, D=16 -> 8 rows per vreg row; ragged batch grid).
    x = jax.random.normal(k_x, (300, 16), jnp.float32)
    y = jax.block_until_ready(mlp_treatnet_forward(x, w1, b1, w2, b2, block_rows=16))
    y_ref = reference_forward(x, w1, b1, w2, b2)
    assert y.shape == (300, num_out)
    assert jnp.allclose(y, y_ref, atol=1e-4, rtol=1e-4), "2-D branch mismatch vs reference"

    # 1-D branch (fully lane-dense; global mean folded into the bias).
    x1 = jax.random.normal(k_x1, (1000,), jnp.float32)
    y1 = jax.block_until_ready(mlp_treatnet_forward(x1, w1, b1, w2, b2))
    y1_ref = reference_forward(x1, w1, b1, w2, b2)
    assert y1.shape == (1000, num_out)
    assert jnp.allclose(y1, y1_ref, atol=1e-4, rtol=1e-4), "1-D branch mismatch vs reference"

    # Wide-feature fallback (D > 128): per-row reductions + MXU predict layer.
    xw = jax.random.normal(k_xw, (50, 192), jnp.float32)
    yw = jax.block_until_ready(mlp_treatnet_forward(xw, w1, b1, w2, b2, block_rows=32))
    yw_ref = reference_forward(xw, w1, b1, w2, b2)
    assert yw.shape == (50, num_out)
    assert jnp.allclose(yw, yw_ref, atol=1e-4, rtol=1e-4), "wide branch mismatch vs reference"

    print("KERNEL_OK")
</pallas_src>

<mosaic_0001>
module attributes {stable_mosaic.version = 11 : i64} {
  func.func @_packed_kernel(%arg0: i32, %arg1: memref<16x128xf32, #tpu.memory_space<vmem>>, %arg2: memref<384x128xf32, #tpu.memory_space<vmem>>, %arg3: memref<1x128xf32, #tpu.memory_space<vmem>>, %arg4: memref<128x24xf32, #tpu.memory_space<vmem>>, %arg5: memref<1x24xf32, #tpu.memory_space<vmem>>, %arg6: memref<16x24xf32, #tpu.memory_space<vmem>>) attributes {dimension_semantics = [#tpu.dimension_semantics<parallel>], iteration_bounds = array<i64: 3>, scalar_prefetch = 0 : i64, scratch_operands = 0 : i64, tpu.core_type = #tpu.core_type<tc>, window_params = [{transform_indices = @transform_0, window_bounds = array<i64: 16, 128>}, {pipeline_mode = #tpu.pipeline_mode<synchronous>, transform_indices = @transform_1, window_bounds = array<i64: 384, 128>}, {pipeline_mode = #tpu.pipeline_mode<synchronous>, transform_indices = @transform_2, window_bounds = array<i64: 1, 128>}, {pipeline_mode = #tpu.pipeline_mode<synchronous>, transform_indices = @transform_3, window_bounds = array<i64: 128, 24>}, {pipeline_mode = #tpu.pipeline_mode<synchronous>, transform_indices = @transform_4, window_bounds = array<i64: 1, 24>}, {transform_indices = @transform_5, window_bounds = array<i64: 16, 24>}]} {
    %c0 = arith.constant 0 : index
    %c0_0 = arith.constant 0 : index
    %0 = vector.load %arg1[%c0, %c0_0] : memref<16x128xf32, #tpu.memory_space<vmem>>, vector<16x128xf32>
    %cst = arith.constant 3.14159274 : f32
    %1 = vector.broadcast %cst : f32 to vector<16x128xf32>
    %2 = arith.mulf %0, %1 : vector<16x128xf32>
    %3 = math.cos %2 : vector<16x128xf32>
    %c0_1 = arith.constant 0 : index
    %c0_2 = arith.constant 0 : index
    %4 = vector.load %arg2[%c0_1, %c0_2] : memref<384x128xf32, #tpu.memory_space<vmem>>, vector<128x128xf32>
    %cst_3 = arith.constant dense<0.000000e+00> : vector<16x128xf32>
    %5 = tpu.matmul %3, %4, %cst_3 {dimension_numbers = #tpu.dot_dimension_numbers<[1], [0], [0], [1], [0, 0, 1, 1], [], []>} : vector<16x128xf32>, vector<128x128xf32>, vector<16x128xf32> -> vector<16x128xf32>
    %6 = math.sin %2 : vector<16x128xf32>
    %c128 = arith.constant 128 : index
    %c0_4 = arith.constant 0 : index
    %7 = vector.load %arg2[%c128, %c0_4] : memref<384x128xf32, #tpu.memory_space<vmem>>, vector<128x128xf32>
    %cst_5 = arith.constant dense<0.000000e+00> : vector<16x128xf32>
    %8 = tpu.matmul %6, %7, %cst_5 {dimension_numbers = #tpu.dot_dimension_numbers<[1], [0], [0], [1], [0, 0, 1, 1], [], []>} : vector<16x128xf32>, vector<128x128xf32>, vector<16x128xf32> -> vector<16x128xf32>
    %9 = arith.addf %5, %8 : vector<16x128xf32>
    %c256 = arith.constant 256 : index
    %c0_6 = arith.constant 0 : index
    %10 = vector.load %arg2[%c256, %c0_6] : memref<384x128xf32, #tpu.memory_space<vmem>>, vector<128x128xf32>
    %cst_7 = arith.constant dense<0.000000e+00> : vector<16x128xf32>
    %11 = tpu.matmul %0, %10, %cst_7 {dimension_numbers = #tpu.dot_dimension_numbers<[1], [0], [0], [1], [0, 0, 1, 1], [], []>} : vector<16x128xf32>, vector<128x128xf32>, vector<16x128xf32> -> vector<16x128xf32>
    %12 = arith.addf %9, %11 : vector<16x128xf32>
    %c0_8 = arith.constant 0 : index
    %c0_9 = arith.constant 0 : index
    %13 = vector.load %arg3[%c0_8, %c0_9] : memref<1x128xf32, #tpu.memory_space<vmem>>, vector<1x128xf32>
    %14 = vector.broadcast %13 : vector<1x128xf32> to vector<16x128xf32>
    %15 = arith.addf %12, %14 : vector<16x128xf32>
    %cst_10 = arith.constant 0.000000e+00 : f32
    %16 = vector.broadcast %cst_10 : f32 to vector<16x128xf32>
    %17 = arith.maximumf %15, %16 : vector<16x128xf32>
    %c0_11 = arith.constant 0 : index
    %c0_12 = arith.constant 0 : index
    %18 = vector.load %arg4[%c0_11, %c0_12] : memref<128x24xf32, #tpu.memory_space<vmem>>, vector<128x24xf32>
    %cst_13 = arith.constant dense<0.000000e+00> : vector<16x24xf32>
    %19 = tpu.matmul %17, %18, %cst_13 {dimension_numbers = #tpu.dot_dimension_numbers<[1], [0], [0], [1], [0, 0, 1, 1], [], []>} : vector<16x128xf32>, vector<128x24xf32>, vector<16x24xf32> -> vector<16x24xf32>
    %c0_14 = arith.constant 0 : index
    %c0_15 = arith.constant 0 : index
    %20 = vector.load %arg5[%c0_14, %c0_15] : memref<1x24xf32, #tpu.memory_space<vmem>>, vector<1x24xf32>
    %21 = vector.broadcast %20 : vector<1x24xf32> to vector<16x24xf32>
    %22 = arith.addf %19, %21 : vector<16x24xf32>
    %c0_16 = arith.constant 0 : index
    %c0_17 = arith.constant 0 : index
    %23 = vector.load %arg6[%c0_16, %c0_17] : memref<16x24xf32, #tpu.memory_space<vmem>>, vector<16x24xf32>
    tpu.vector_store %arg6[%c0_16, %c0_17], %22 {strides = array<i32>} : memref<16x24xf32, #tpu.memory_space<vmem>>, vector<16x24xf32>,
    return
  }
  func.func @transform_0(%arg0: i32) -> (i32, i32) {
    %c0_i32 = arith.constant 0 : i32
    %c0_i32_0 = arith.constant 0 : i32
    return %arg0, %c0_i32 : i32, i32
  }
  func.func @transform_1(%arg0: i32) -> (i32, i32) {
    %c0_i32 = arith.constant 0 : i32
    %c0_i32_0 = arith.constant 0 : i32
    %c0_i32_1 = arith.constant 0 : i32
    return %c0_i32, %c0_i32_0 : i32, i32
  }
  func.func @transform_2(%arg0: i32) -> (i32, i32) {
    %c0_i32 = arith.constant 0 : i32
    %c0_i32_0 = arith.constant 0 : i32
    %c0_i32_1 = arith.constant 0 : i32
    return %c0_i32, %c0_i32_0 : i32, i32
  }
  func.func @transform_3(%arg0: i32) -> (i32, i32) {
    %c0_i32 = arith.constant 0 : i32
    %c0_i32_0 = arith.constant 0 : i32
    %c0_i32_1 = arith.constant 0 : i32
    return %c0_i32, %c0_i32_0 : i32, i32
  }
  func.func @transform_4(%arg0: i32) -> (i32, i32) {
    %c0_i32 = arith.constant 0 : i32
    %c0_i32_0 = arith.constant 0 : i32
    %c0_i32_1 = arith.constant 0 : i32
    return %c0_i32, %c0_i32_0 : i32, i32
  }
  func.func @transform_5(%arg0: i32) -> (i32, i32) {
    %c0_i32 = arith.constant 0 : i32
    %c0_i32_0 = arith.constant 0 : i32
    return %arg0, %c0_i32 : i32, i32
  }
}

</mosaic_0001>

<bundles_post_ra>
// kernel: tpu_custom_call.1
= control target key start
LH: loop header
LB: loop body
LE: loop exit
PB: predicated region body
PF: predicated region fallthrough
CT: control target
= control target key end

     0   :  { %10 = vsyncpa [#allocation3], 0  ;;  %s1837_s18 = smov 0   ;;  %s1839_s19 = smov 0   ;;  %s2128_s0 = inlined_call_operand.vmem [shape: f32[40,128], index: 0, kind: input, shape index: {}]   ;;  %s2129_s1 = inlined_call_operand.hbm [shape: f32[384,128], index: 1, kind: input, shape index: {}]   ;;  %s2130_s2 = inlined_call_operand.vmem [shape: f32[1,128], index: 2, kind: input, shape index: {}]   ;;  %s2131_s3 = inlined_call_operand.vmem [shape: f32[128,24], index: 3, kind: input, shape index: {}]   ;;  %s2132_s4 = inlined_call_operand.vmem [shape: f32[1,24], index: 4, kind: input, shape index: {}]   ;;  %s2133_s5 = inlined_call_operand.vmem [shape: f32[40,24], index: 5, kind: output, shape index: {}]  }
   0x1   :  { %s1841_s20 = smov 0  }
   0x2 LB: > { %s1850_s21 = sadd.s32 4294967295, %s1764_s20   ;;  %s1852_s22 = sadd.s32 1, %s1764_s20   ;;  %s1764_s20 = sphi %s1841_s20, %s2138_s20   ;;  %s1760_s19 = sphi %s1839_s19, %s2137_s19   ;;  %s1756_s18 = sphi %s1837_s18, %s2136_s18  }
   0x3   : > { %s130_s23 = ssub.s32 %s1764_s20, %s1852_s22  ;;  %s133_s24 = sadd.s32 1, %s1760_s19 }
   0x4   : > { %p131_p0 = scmp.eq.s32.totalorder %s130_s23, 0  ;;  %p143_p1 = scmp.ne.s32.totalorder %s1760_s19, %s1756_s18 }
   0x5   : > { %p144_p2 = scmp.eq.s32.totalorder %s1850_s21, 2  ;;  %p1299_p3 = scmp.ge.s32.totalorder %s1764_s20, 1 }
   0x6   : > { %s1860_s25 = scalar_select %p131_p0, %s1760_s19, %s133_s24  }
   0x7   : > { %p1862_p4 = por %p144_p2, %p143_p1  ;;  %p157_p5 = scmp.lt.s32.totalorder %s1764_s20, 4 }
   0x8   : > { %p1573_p6 = scmp.eq.s32.totalorder %s1850_s21, 0  ;;  %s1798_s28 = smov [#allocation2]  }
   0x9   : > { %p1867_p7 = pnand %p1299_p3, %p157_p5  ;;  %s169_s29 = sshll.u32 %s1798_s28, 4  ;;  %s170_s29 = int_to_ptr.vmem [resolvable:$true] %s169_s29 }
   0xa   : > { %s1691_s30 = scalar_lea.vmem %s170_s29, 6144  ;;  %p1699_p0 = scmp.lt.s32.totalorder %s170_s29, %s170_s29 }
   0xb   : > { %p1569_p8 = pneg %p1867_p7  ;;  %p1692_p11 = scmp.ne.s32.totalorder %s170_s29, %s1691_s30 }
   0xc   : > { %p1700_p1 = scmp.lt.s32.totalorder %s1691_s30, %s1691_s30 }
   0xd   : > { %p1570_p9 = pnand %p1573_p6, %p1569_p8 }
   0xe   : > { %p1701_p2 = por %p1700_p1, %p1699_p0 }
   0xf   : > { %p1682_p10 = pneg %p1570_p9 }
  0x11   : > { %p1694_p12 = pnand %p1692_p11, %p1682_p10 }
  0x13   : > { %p1695_p13 = pneg %p1694_p12 }
  0x15   : > { %p1702_p3 = pnand %p1701_p2, %p1695_p13 }
  0x17   : > { %1705 = shalt.err (!%p1702_p3)
}
  0x18   : > { %s1799_s6 = smov 128   ;;  %s1800_s7 = smov 8  }
  0x19   : > { %1572 = dma.hbm_to_vmem [thread:$0]  (!%p1570_p9), %s2129_s1, 6144, %s170_s29, [#allocation3], %s1799_s6, %s1799_s6, %s1800_s7  }
  0x1a   : > { %211 = sbr.rel (%p1867_p7) target bundleno = 605 (0x25d), region = 40 }
  0x1f   : > { %1751 = dma.done.wait (%p1573_p6), [#allocation3], 6144  }
  0x20   : > { %1753 = vsyncadd (%p1573_p6), [#allocation3], 4294961152  ;;  %s1885_s10 = sshll.u32 %s1850_s21, 1  ;;  %v710_v0 = vld [vmem:[#allocation2 + $0xf8] sm:$0xff]  ;;  %v709_v2 = vld [vmem:[#allocation2 + $0xf0] sm:$0xff]  ;;  %s239_s14 = sand.u32 1, %s1756_s18  }
  0x21   : > { %p247_p5 = scmp.lt.s32.totalorder %s1885_s10, 4  ;;  %v486_v1 = vld [vmem:[#allocation2 + $0x78] sm:$0xff]  ;;  %1417 = vmatprep.subr.mxu0 %v710_v0  ;;  %v485_v3 = vld [vmem:[#allocation2 + $0x70] sm:$0xff]  ;;  %v708_v4 = vld [vmem:[#allocation2 + $0xe8] sm:$0xff]  ;;  %v1801_v53 = vmov 683565275  }
  0x22   : > { %1452 = vmatprep.subr.mxu1 %v486_v1  ;;  %1418 = vmatpush3.msra.mxu0 %v710_v0  ;;  %v484_v5 = vld [vmem:[#allocation2 + $0x68] sm:$0xff]  ;;  %v707_v6 = vld [vmem:[#allocation2 + $0xe0] sm:$0xff]  ;;  %v706_v8 = vld [vmem:[#allocation2 + $0xd8] sm:$0xff]  ;;  %v1802_v55 = vmov 2475754826   ;;  %s1074_s18 = ssub.s32 (%p1862_p4), 5, %s1885_s10 }
  0x23   : > { %s248_s11 = scalar_select %p247_p5, %s1885_s10, 4  ;;  %1453 = vmatpush3.msra.mxu1 %v486_v1  ;;  %1419 = vmatprep.subr.mxu0 %v709_v2  ;;  %v483_v7 = vld [vmem:[#allocation2 + $0x60] sm:$0xff]  ;;  %v482_v9 = vld [vmem:[#allocation2 + $0x58] sm:$0xff]  ;;  %v705_v10 = vld [vmem:[#allocation2 + $0xd0] sm:$0xff]  ;;  %v1803_v60 = vmov 2131351028  }
  0x24   : > { %1454 = vmatprep.subr.mxu1 %v485_v3  ;;  %1420 = vmatpush3.msra.mxu0 %v709_v2  ;;  %v481_v11 = vld [vmem:[#allocation2 + $0x50] sm:$0xff]  ;;  %v704_v12 = vld [vmem:[#allocation2 + $0xc8] sm:$0xff]  ;;  %v703_v17 = vld [vmem:[#allocation2 + $0xc0] sm:$0xff]  ;;  %v1804_v62 = vmov 2102212464   ;;  %s1342_s23 = sshll.u32 (%p1862_p4), %s1850_s21, 4 }
  0x25   : > { %1455 = vmatpush3.msra.mxu1 %v485_v3  ;;  %s1306_s12 = sshll.u32 %s248_s11, 3  ;;  %1421 = vmatprep.subr.mxu0 %v708_v4  ;;  %v480_v13 = vld [vmem:[#allocation2 + $0x48] sm:$0xff]  ;;  %v479_v18 = vld [vmem:[#allocation2 + $0x40] sm:$0xff]  ;;  %v702_v22 = vld [vmem:[#allocation2 + $0xb8] sm:$0xff]  ;;  %v1805_v0 = vmov 920167782   ;;  %s2094_s28 = scalar_lea.vmem (%p1862_p4), %s2133_s5, %s1342_s23  }
  0x26   : > { %1456 = vmatprep.subr.mxu1 %v484_v5  ;;  %1422 = vmatpush3.msra.mxu0 %v708_v4  ;;  %s250_s15 = scalar_lea.vmem %s2128_s0, %s1306_s12  ;;  %v478_v23 = vld [vmem:[#allocation2 + $0x38] sm:$0xff]  ;;  %v701_v26 = vld [vmem:[#allocation2 + $0xb0] sm:$0xff]  ;;  %v700_v33 = vld [vmem:[#allocation2 + $0xa8] sm:$0xff]  ;;  %p1075_p6 = scmp.lt.s32.totalorder (%p1862_p4), %s1074_s18, 2 }
  0x27   : > { %1457 = vmatpush3.msra.mxu1 %v484_v5  ;;  %1423 = vmatprep.subr.mxu0 %v707_v6  ;;  %v1892_v14 = vld [vmem:[%s250_s15] sm:$0xff]  ;;  %v1897_v16 = vld [vmem:[%s250_s15 + $0x8] sm:$0xff]  ;;  %v477_v28 = vld [vmem:[#allocation2 + $0x30] sm:$0xff]  ;;  %s1304_s15 = sshll.u32 %s239_s14, 4 }
  0x28   : > { %1458 = vmatprep.subr.mxu1 %v483_v7  ;;  %1424 = vmatpush3.msra.mxu0 %v707_v6  ;;  %v1895_v15 = vmul.f32 3.1415927, %v1892_v14  ;;  %v1900_v19 = vmul.f32 3.1415927, %v1897_v16  ;;  %v476_v34 = vld [vmem:[#allocation2 + $0x28] sm:$0xff]  ;;  %v699_v37 = vld [vmem:[#allocation2 + $0xa0] sm:$0xff] }
  0x29   : > { %1459 = vmatpush3.msra.mxu1 %v483_v7  ;;  %1425 = vmatprep.subr.mxu0 %v706_v8  ;;  %v475_v38 = vld [vmem:[#allocation2 + $0x20] sm:$0xff]  ;;  %v698_v42 = vld [vmem:[#allocation2 + $0x98] sm:$0xff]  ;;  %v697_v48 = vld [vmem:[#allocation2 + $0x90] sm:$0xff]  ;;  %s2083_s20 = scalar_lea.vmem [#allocation4], %s1304_s15  }
  0x2a   : > { %1460 = vmatprep.subr.mxu1 %v482_v9  ;;  %1426 = vmatpush3.msra.mxu0 %v706_v8  ;;  %v265_v20 = vand.u32 2147483647, %v1895_v15  ;;  %v268_v21 = vand.u32 2139095040, %v1895_v15  ;;  %v368_v24 = vand.u32 2147483647, %v1900_v19  ;;  %v371_v25 = vand.u32 2139095040, %v1900_v19 }
  0x2b   : > { %1461 = vmatpush3.msra.mxu1 %v482_v9  ;;  %1427 = vmatprep.subr.mxu0 %v705_v10  ;;  %v474_v43 = vld [vmem:[#allocation2 + $0x18] sm:$0xff]  ;;  %v473_v49 = vld [vmem:[#allocation2 + $0x10] sm:$0xff]  ;;  %v696_v58 = vld [vmem:[#allocation2 + $0x88] sm:$0xff]  ;;  %vm267_vm14 = vcmp.lt.s32.totalorder %v1895_v15, 0 }
  0x2c   : > { %1462 = vmatprep.subr.mxu1 %v481_v11  ;;  %1428 = vmatpush3.msra.mxu0 %v705_v10  ;;  %v269_v27 = vshrl.u32 %v268_v21, 23  ;;  %v272_v29 = vand.u32 8388607, %v265_v20  ;;  %v372_v30 = vshrl.u32 %v371_v25, 23  ;;  %v375_v31 = vand.u32 8388607, %v368_v24 }
  0x2d   : > { %1463 = vmatpush3.msra.mxu1 %v481_v11  ;;  %1429 = vmatprep.subr.mxu0 %v704_v12  ;;  %v472_v59 = vld [vmem:[#allocation2 + $0x8] sm:$0xff]  ;;  %v695_v6 = vld [vmem:[#allocation2 + $0x80] sm:$0xff]  ;;  %v1806_v10 = vmov 1326507024   ;;  %vm266_vm15 = vcmp.le.f32.partialorder %v265_v20, 0.7853982 }
  0x2e   : > { %1464 = vmatprep.subr.mxu1 %v480_v13  ;;  %1430 = vmatpush3.msra.mxu0 %v704_v12  ;;  %v1307_v32 = vadd.s32 4294967169, %v269_v27  ;;  %v1311_v35 = vadd.s32 4294967169, %v372_v30  ;;  %v273_v39 = vor.u32 8388608, %v272_v29  ;;  %v376_v40 = vor.u32 8388608, %v375_v31  ;;  %v471_v7 = vld [vmem:[#allocation2] sm:$0xff] }
  0x2f   : > { %1465 = vmatpush3.msra.mxu1 %v480_v13  ;;  %1431 = vmatprep.subr.mxu0 %v703_v17 }
  0x30   : > { %1466 = vmatprep.subr.mxu1 %v479_v18  ;;  %1432 = vmatpush3.msra.mxu0 %v703_v17  ;;  %v275_v36 = vadd.s32 1, %v1307_v32  ;;  %v378_v41 = vadd.s32 1, %v1311_v35  ;;  %v1912_v50 = vshll.u32 %v273_v39, 8  ;;  %v1914_v51 = vshll.u32 %v376_v40, 8 }
  0x31   : > { %1467 = vmatpush3.msra.mxu1 %v479_v18  ;;  %1433 = vmatprep.subr.mxu0 %v702_v22 }
  0x32   : > { %1468 = vmatprep.subr.mxu1 %v478_v23  ;;  %1434 = vmatpush3.msra.mxu0 %v702_v22  ;;  %vm276_vm0 = vcmp.gt.s32.totalorder %v275_v36, 0  ;;  %vm379_vm1 = vcmp.gt.s32.totalorder %v378_v41, 0 }
  0x33   : > { %1469 = vmatpush3.msra.mxu1 %v478_v23  ;;  %1435 = vmatprep.subr.mxu0 %v701_v26  ;;  %v277_v44 = vsel %vm276_vm0, %v275_v36, 0  ;;  %v380_v47 = vsel %vm379_vm1, %v378_v41, 0  ;;  %v1933_v23 = vld [vmem:[#allocation2 + $0x178] sm:$0xff]  ;;  %vm370_vm0 = vcmp.lt.s32.totalorder %v1900_v19, 0  ;;  %vm369_vm1 = vcmp.le.f32.partialorder %v368_v24, 0.7853982 }
  0x34   : > { %1470 = vmatprep.subr.mxu1 %v477_v28  ;;  %1436 = vmatpush3.msra.mxu0 %v701_v26  ;;  %v1910_v45 = vshrl.u32 %v277_v44, 5  ;;  %v279_v46 = vand.u32 31, %v277_v44  ;;  %v1918_v57 = vand.u32 31, %v380_v47  ;;  %v1922_v2 = vshrl.u32 %v380_v47, 5 }
  0x35   : > { %1471 = vmatpush3.msra.mxu1 %v477_v28  ;;  %1437 = vmatprep.subr.mxu0 %v700_v33 }
  0x36   : > { %1472 = vmatprep.subr.mxu1 %v476_v34  ;;  %1438 = vmatpush3.msra.mxu0 %v700_v33  ;;  %v280_v52 = vsub.s32 32, %v279_v46  ;;  %v282_v54 = vshll.u32 %v1801_v53, %v279_v46  ;;  %v285_v56 = vshll.u32 %v1802_v55, %v279_v46  ;;  %v288_v61 = vshll.u32 %v1803_v60, %v279_v46 }
  0x37   : > { %1473 = vmatpush3.msra.mxu1 %v476_v34  ;;  %1439 = vmatprep.subr.mxu0 %v699_v37  ;;  %v291_v63 = vshll.u32 %v1804_v62, %v279_v46  ;;  %v294_v1 = vshll.u32 %v1805_v0, %v279_v46  ;;  %vm297_vm2 = vcmp.lt.s32.totalorder %v1910_v45, 1  ;;  %vm298_vm3 = vcmp.lt.s32.totalorder %v1910_v45, 2 }
  0x38   : > { %1474 = vmatprep.subr.mxu1 %v475_v38  ;;  %1440 = vmatpush3.msra.mxu0 %v699_v37  ;;  %v281_v3 = vshrl.u32 %v1801_v53, %v280_v52  ;;  %v283_v4 = vshrl.u32 %v1802_v55, %v280_v52  ;;  %v286_v5 = vshrl.u32 %v1803_v60, %v280_v52  ;;  %vm300_vm4 = vcmp.lt.s32.totalorder %v1910_v45, 4 }
  0x39   : > { %1475 = vmatpush3.msra.mxu1 %v475_v38  ;;  %1441 = vmatprep.subr.mxu0 %v698_v42  ;;  %v289_v8 = vshrl.u32 %v1804_v62, %v280_v52  ;;  %v292_v9 = vshrl.u32 %v1805_v0, %v280_v52  ;;  %v295_v11 = vshrl.u32 %v1806_v10, %v280_v52  ;;  %v383_v17 = vsub.s32 32, %v1918_v57 }
  0x3a   : > { %1476 = vmatprep.subr.mxu1 %v474_v43  ;;  %1442 = vmatpush3.msra.mxu0 %v698_v42  ;;  %v284_v12 = vor.u32 %v283_v4, %v282_v54  ;;  %v287_v13 = vor.u32 %v286_v5, %v285_v56  ;;  %vm299_vm5 = vcmp.lt.s32.totalorder %v1910_v45, 3  ;;  %v385_v27 = vshll.u32 %v1801_v53, %v1918_v57 }
  0x3b   : > { %1477 = vmatpush3.msra.mxu1 %v474_v43  ;;  %1443 = vmatprep.subr.mxu0 %v697_v48  ;;  %v290_v18 = vor.u32 %v289_v8, %v288_v61  ;;  %v293_v21 = vor.u32 %v292_v9, %v291_v63  ;;  %v296_v22 = vor.u32 %v295_v11, %v294_v1  ;;  %vm400_vm6 = vcmp.lt.s32.totalorder %v1922_v2, 1 }
  0x3c   : > { %1478 = vmatprep.subr.mxu1 %v473_v49  ;;  %1444 = vmatpush3.msra.mxu0 %v697_v48  ;;  %v301_v25 = vsel %vm297_vm2, %v281_v3, %v284_v12  ;;  %v305_v26 = vsel %vm297_vm2, %v284_v12, %v287_v13  ;;  %v386_v35 = vshrl.u32 %v1802_v55, %v383_v17  ;;  %vm401_vm7 = vcmp.lt.s32.totalorder %v1922_v2, 2 }
  0x3d   : > { %1479 = vmatpush3.msra.mxu1 %v473_v49  ;;  %1445 = vmatprep.subr.mxu0 %v696_v58  ;;  %v302_v28 = vsel %vm300_vm4, %v290_v18, 2102212464  ;;  %v306_v29 = vsel %vm300_vm4, %v293_v21, 920167782  ;;  %v309_v30 = vsel %vm297_vm2, %v287_v13, %v290_v18  ;;  %v310_v31 = vsel %vm300_vm4, %v296_v22, 1326507024 }
  0x3e   : > { %1480 = vmatprep.subr.mxu1 %v472_v59  ;;  %1446 = vmatpush3.msra.mxu0 %v696_v58  ;;  %v303_v32 = vsel %vm299_vm5, %v287_v13, %v302_v28  ;;  %v307_v33 = vsel %vm299_vm5, %v290_v18, %v306_v29  ;;  %v311_v34 = vsel %vm299_vm5, %v293_v21, %v310_v31  ;;  %vm403_vm9 = vcmp.lt.s32.totalorder %v1922_v2, 4 }
  0x3f   : > { %1481 = vmatpush3.msra.mxu1 %v472_v59  ;;  %1447 = vmatprep.subr.mxu0 %v695_v6  ;;  %v304_v36 = vsel %vm298_vm3, %v301_v25, %v303_v32  ;;  %v308_v37 = vsel %vm298_vm3, %v305_v26, %v307_v33  ;;  %v312_v38 = vsel %vm298_vm3, %v309_v30, %v311_v34  ;;  %vm402_vm10 = vcmp.lt.s32.totalorder %v1922_v2, 3 }
  0x40   : > { %1482 = vmatprep.subr.mxu1 %v471_v7  ;;  %1448 = vmatpush3.msra.mxu0 %v695_v6  ;;  %v388_v39 = vshll.u32 %v1802_v55, %v1918_v57  ;;  %v1967_v40 = vmul.u32.u64.low %v1912_v50, %v312_v38  ;;  %v1968_v41 = vmul.u32.u64.high %v1912_v50, %v312_v38, %v1967_v40  ;;  %v384_v44 = vshrl.u32 %v1801_v53, %v383_v17 }
  0x41   : > { %1483 = vmatpush3.msra.mxu1 %v471_v7  ;;  %1487 = vmatprep.subr.mxu0 %v1933_v23  ;;  %v1971_v42 = vmul.u32.u64.low %v1912_v50, %v308_v37  ;;  %v1972_v43 = vmul.u32.u64.high %v1912_v50, %v308_v37, %v1971_v42  ;;  %v387_v46 = vor.u32 %v386_v35, %v385_v27  ;;  %v389_v47 = vshrl.u32 %v1803_v60, %v383_v17 }
  0x42   : > { %v391_v48 = vshll.u32 %v1803_v60, %v1918_v57  ;;  %v392_v45 = vshrl.u32 %v1804_v62, %v383_v17  ;;  %v394_v49 = vshll.u32 %v1804_v62, %v1918_v57  ;;  %v395_v52 = vshrl.u32 %v1805_v0, %v383_v17 }
  0x43   : > { %v397_v54 = vshll.u32 %v1805_v0, %v1918_v57  ;;  %v320_v55 = vmul.u32 %v1912_v50, %v304_v36  ;;  %v390_v56 = vor.u32 %v389_v47, %v388_v39  ;;  %v398_v58 = vshrl.u32 %v1806_v10, %v383_v17 }
  0x44   : > { %vm322_vm8 = vc.u32 %v1968_v41, %v1971_v42  ;;  %v323_v53 = vadd.s32 1, %v1972_v43  ;;  %v393_v59 = vor.u32 %v392_v45, %v391_v48  ;;  %v396_v60 = vor.u32 %v395_v52, %v394_v49 }
  0x45   : > { %v399_v61 = vor.u32 %v398_v58, %v397_v54  ;;  %v404_v57 = vsel %vm400_vm6, %v384_v44, %v387_v46  ;;  %v408_v63 = vsel %vm400_vm6, %v387_v46, %v390_v56  ;;  %v321_v36 = vadd.s32 %v1971_v42, %v1968_v41 }
  0x46   : > { %v324_v50 = vsel %vm322_vm8, %v323_v53, %v1972_v43  ;;  %v405_v62 = vsel %vm403_vm9, %v393_v59, 2102212464  ;;  %v412_v0 = vsel %vm400_vm6, %v390_v56, %v393_v59  ;;  %v409_v4 = vsel %vm403_vm9, %v396_v60, 920167782 }
  0x47   : > { %v325_v1 = vadd.s32 %v324_v50, %v320_v55  ;;  %v406_v3 = vsel %vm402_vm10, %v390_v56, %v405_v62  ;;  %v413_v5 = vsel %vm403_vm9, %v399_v61, 1326507024  ;;  %v410_v6 = vsel %vm402_vm10, %v393_v59, %v409_v4 }
  0x48   : > { %v414_v7 = vsel %vm402_vm10, %v396_v60, %v413_v5  ;;  %v407_v9 = vsel %vm401_vm7, %v404_v57, %v406_v3  ;;  %v411_v10 = vsel %vm401_vm7, %v408_v63, %v410_v6  ;;  %vm357_vm8 = vweird.f32 %v1895_v15 }
  0x49   : > { %v326_v8 = vadd.s32 536870912, %v325_v1  ;;  %v415_v11 = vsel %vm401_vm7, %v412_v0, %v414_v7  ;;  %v2006_v17 = vmul.u32.u64.low %v1914_v51, %v411_v10  ;;  %v2007_v18 = vmul.u32.u64.high %v1914_v51, %v411_v10, %v2006_v17 }
  0x4a   : > { %v2002_v12 = vmul.u32.u64.low %v1914_v51, %v415_v11  ;;  %v2003_v13 = vmul.u32.u64.high %v1914_v51, %v415_v11, %v2002_v12  ;;  %v423_v25 = vmul.u32 %v1914_v51, %v407_v9 }
  0x4b   : > { %v327_v21 = vshrl.u32 %v326_v8, 30  ;;  %v426_v26 = vadd.s32 1, %v2007_v18 }
  0x4c   : > { %vm425_vm11 = vc.u32 %v2003_v13, %v2006_v17  ;;  %v424_v58 = vadd.s32 %v2006_v17, %v2003_v13 }
  0x4d   : > { %v328_v22 = vshll.u32 %v327_v21, 30  ;;  %v427_v2 = vsel %vm425_vm11, %v426_v26, %v2007_v18  ;;  %v351_v53 = vsub.s32 4, %v327_v21 }
  0x4e   : > { %v428_v29 = vadd.s32 %v427_v2, %v423_v25 }
  0x4f   : > { %v329_v27 = vsub.s32 %v325_v1, %v328_v22  ;;  %v352_v0 = vsel %vm267_vm14, %v351_v53, %v327_v21  ;;  %v865_v53 = vld [vmem:[#allocation2 + $0x120] sm:$0xff] }
  0x50   : > { %v429_v31 = vadd.s32 536870912, %v428_v29  ;;  %v354_v7 = vsel %vm266_vm15, 0, %v352_v0  ;;  %v976_v0 = vld [vmem:[%s2131_s3 + $0x58] sm:$0xff] }
  0x51   : > { %v331_v28 = vsub.s32 0, %v329_v27  ;;  %v580_v9 = vadd.s32 3, %v354_v7  ;;  %v358_v13 = vand.u32 3, %v354_v7  ;;  %v970_v7 = vld [vmem:[%s2131_s3 + $0x28] sm:$0xff] }
  0x52   : > { %v430_v33 = vshrl.u32 %v429_v31, 30 }
  0x53   : > { %v1308_v30 = vmin.u32 %v331_v28, %v329_v27  ;;  %v581_v12 = vand.u32 3, %v580_v9  ;;  %vm363_vm3 = vcmp.eq.s32.totalorder %v358_v13, 2  ;;  %vm360_vm5 = vcmp.eq.s32.totalorder %v358_v13, 0  ;;  %v968_v9 = vld [vmem:[%s2131_s3 + $0x18] sm:$0xff] }
  0x54   : > { %v431_v35 = vshll.u32 %v430_v33, 30  ;;  %v454_v20 = vsub.s32 4, %v430_v33  ;;  %vm359_vm7 = vcmp.lt.s32.totalorder %v358_v13, 2 }
  0x55   : > { %v333_v32 = vclz %v1308_v30  ;;  %vm586_vm2 = vcmp.eq.s32.totalorder %v581_v12, 2  ;;  %vm583_vm4 = vcmp.eq.s32.totalorder %v581_v12, 0  ;;  %vm582_vm6 = vcmp.lt.s32.totalorder %v581_v12, 2 }
  0x56   : > { %v432_v51 = vsub.s32 %v428_v29, %v431_v35  ;;  %v455_v18 = vsel %vm370_vm0, %v454_v20, %v430_v33  ;;  %v966_v20 = vld [vmem:[%s2131_s3 + $0x8] sm:$0xff] }
  0x57   : > { %v1309_v34 = vadd.s32 4294967294, %v333_v32  ;;  %v457_v25 = vsel %vm369_vm1, 0, %v455_v18 }
  0x58   : > { %v434_v43 = vsub.s32 0, %v432_v51  ;;  %v684_v29 = vadd.s32 3, %v457_v25 }
  0x59   : > { %vm1310_vm12 = vcmp.lt.s32.totalorder %v1309_v34, 0 }
  0x5a   : > { %v336_v37 = vsel %vm1310_vm12, 0, %v1309_v34  ;;  %v1312_v47 = vmin.u32 %v434_v43, %v432_v51 }
  0x5b   : > { %v337_v38 = vsub.s32 32, %v336_v37  ;;  %v338_v39 = vshll.u32 %v329_v27, %v336_v37  ;;  %v341_v40 = vsub.s32 4294967266, %v336_v37  ;;  %v461_v37 = vand.u32 3, %v457_v25 }
  0x5c   : > { %v436_v49 = vclz %v1312_v47 }
  0x5d   : > { %v339_v44 = vshrl.u32 %v321_v36, %v337_v38  ;;  %v342_v46 = vadd.s32 127, %v341_v40  ;;  %v685_v36 = vand.u32 3, %v684_v29  ;;  %vm466_vm10 = vcmp.eq.s32.totalorder %v461_v37, 2 }
  0x5e   : > { %v1313_v55 = vadd.s32 4294967294, %v436_v49  ;;  %vm463_vm12 = vcmp.eq.s32.totalorder %v461_v37, 0 }
  0x5f   : > { %v340_v48 = vor.u32 %v339_v44, %v338_v39  ;;  %v343_v45 = vshll.u32 %v342_v46, 23  ;;  %vm690_vm9 = vcmp.eq.s32.totalorder %v685_v36, 2  ;;  %vm687_vm11 = vcmp.eq.s32.totalorder %v685_v36, 0 }
  0x60   : > { %vm1314_vm13 = vcmp.lt.s32.totalorder %v1313_v55, 0 }
  0x61   : > { %v344_v52 = vor.u32 4788187, %v343_v45  ;;  %v347_v54 = vcvt.s32.f32 %v340_v48  ;;  %v439_v42 = vsel %vm1314_vm13, 0, %v1313_v55  ;;  %vm686_vm13 = vcmp.lt.s32.totalorder %v685_v36, 2  ;;  %v873_v55 = vld [vmem:[#allocation2 + $0x160] sm:$0xff] }
  0x62   : > { %v440_v59 = vsub.s32 32, %v439_v42  ;;  %v441_v60 = vshll.u32 %v432_v51, %v439_v42  ;;  %v444_v61 = vsub.s32 4294967266, %v439_v42  ;;  %v866_v42 = vld [vmem:[#allocation2 + $0x128] sm:$0xff] }
  0x63   : > { %v345_v56 = vand.u32 2147483647, %v344_v52  ;;  %v875_v52 = vld [vmem:[#allocation2 + $0x170] sm:$0xff] }
  0x64   : > { %v442_v50 = vshrl.u32 %v424_v58, %v440_v59  ;;  %v445_v62 = vadd.s32 127, %v444_v61  ;;  %v870_v58 = vld [vmem:[#allocation2 + $0x148] sm:$0xff]  ;;  %v864_v59 = vld [vmem:[#allocation2 + $0x118] sm:$0xff] }
  0x65   : > { %v348_v41 = vmul.f32 %v347_v54, %v345_v56  ;;  %v874_v54 = vld [vmem:[#allocation2 + $0x168] sm:$0xff]  ;;  %v871_v56 = vld [vmem:[#allocation2 + $0x150] sm:$0xff] }
  0x66   : > { %v443_v3 = vor.u32 %v442_v50, %v441_v60  ;;  %v446_v4 = vshll.u32 %v445_v62, 23  ;;  %v863_v60 = vld [vmem:[#allocation2 + $0x110] sm:$0xff]  ;;  %v862_v61 = vld [vmem:[#allocation2 + $0x108] sm:$0xff]  ;;  %v980_v50 = vld [vmem:[%s2131_s3 + $0x78] sm:$0xff] }
  0x67   : > { %v349_v57 = vxor.u32 2147483648, %v348_v41  ;;  %v979_v62 = vld [vmem:[%s2131_s3 + $0x70] sm:$0xff]  ;;  %1522 = vmatprep.subr.mxu1 %v980_v50 }
  0x68   : > { %v447_v5 = vor.u32 4788187, %v446_v4  ;;  %v450_v6 = vcvt.s32.f32 %v443_v3  ;;  %v974_v3 = vld [vmem:[%s2131_s3 + $0x48] sm:$0xff]  ;;  %v973_v4 = vld [vmem:[%s2131_s3 + $0x40] sm:$0xff] }
  0x69   : > { %v350_v63 = vsel %vm267_vm14, %v349_v57, %v348_v41  ;;  %vm462_vm14 = vcmp.lt.s32.totalorder %v461_v37, 2  ;;  %v869_v41 = vld [vmem:[#allocation2 + $0x140] sm:$0xff] }
  0x6a   : > { %v353_v1 = vsel %vm266_vm15, %v1895_v15, %v350_v63  ;;  %v448_v8 = vand.u32 2147483647, %v447_v5  ;;  %vm460_vm15 = vweird.f32 %v1900_v19  ;;  %v861_v57 = vld [vmem:[#allocation2 + $0x100] sm:$0xff]  ;;  %v978_v63 = vld [vmem:[%s2131_s3 + $0x68] sm:$0xff]  ;;  %v972_v5 = vld [vmem:[%s2131_s3 + $0x38] sm:$0xff] }
  0x6b   : > { %1672 = vcosq.f32 %v353_v1 }
  0x6c   : > { %1674 = vsinq.f32 %v353_v1  ;;  %v451_v10 = vmul.f32 %v450_v6, %v448_v8  ;;  %v975_v1 = vld [vmem:[%s2131_s3 + $0x50] sm:$0xff]  ;;  %v969_v8 = vld [vmem:[%s2131_s3 + $0x20] sm:$0xff] }
  0x6d   : > { %v971_v6 = vld [vmem:[%s2131_s3 + $0x30] sm:$0xff] }
  0x6e   : > { %v452_v11 = vxor.u32 2147483648, %v451_v10 }
  0x70   : > { %v453_v17 = vsel %vm370_vm0, %v452_v11, %v451_v10  ;;  %v967_v10 = vld [vmem:[%s2131_s3 + $0x10] sm:$0xff]  ;;  %v965_v11 = vld [vmem:[%s2131_s3] sm:$0xff]  ;;  %vm1063_vm0 = vcmask 195584  }
  0x71   : > { %v456_v21 = vsel %vm369_vm1, %v1900_v19, %v453_v17  ;;  %v872_v19 = vld [vmem:[#allocation2 + $0x158] sm:$0xff] }
  0x72   : > { %1676 = vcosq.f32 %v456_v21 }
  0x73   : > { %1678 = vsinq.f32 %v456_v21 }
  0x78   : > { %v1673_v22 = vpop.eup %1672 }
  0x79   : > { %v1675_v26 = vpop.eup %1674  ;;  %v364_v27 = vxor.u32 2147483648, %v1673_v22 }
  0x7a   : > { %v361_v2 = vxor.u32 2147483648, %v1675_v26 }
  0x7b   : > { %v588_v24 = vsel %vm586_vm2, %v364_v27, %v1675_v26  ;;  %v365_v28 = vsel %vm363_vm3, %v364_v27, %v1675_v26  ;;  %v1323_v27 = vld [vmem:[%s2130_s2] ss:$0 sm:$0xff] }
  0x7c   : > { %v585_v30 = vsel %vm583_vm4, %v1673_v22, %v361_v2  ;;  %v362_v31 = vsel %vm360_vm5, %v1673_v22, %v361_v2 }
  0x7d   : > { %v589_v32 = vsel %vm582_vm6, %v585_v30, %v588_v24  ;;  %v366_v33 = vsel %vm359_vm7, %v362_v31, %v365_v28 }
  0x7e   : > { %v590_v34 = vsel %vm357_vm8, nan, %v589_v32  ;;  %v367_v35 = vsel %vm357_vm8, nan, %v366_v33  ;;  %v1324_v32 = vld [vmem:[%s2132_s4] ss:$0 sm:$0xff] }
  0x7f   : > { %1449 = vmatprep.mubr.f32.mxu0 %v590_v34  ;;  %1484 = vmatprep.mubr.f32.mxu1 %v367_v35  ;;  %v1677_v51 = vpop.eup %1676 }
  0x80   : > { %v1679_v38 = vpop.eup %1678  ;;  %v467_v39 = vxor.u32 2147483648, %v1677_v51 }
  0x81   : > { %v464_v15 = vxor.u32 2147483648, %v1679_v38 }
  0x82   : > { %v692_v40 = vsel %vm690_vm9, %v467_v39, %v1679_v38  ;;  %v468_v43 = vsel %vm466_vm10, %v467_v39, %v1679_v38 }
  0x83   : > { %v689_v44 = vsel %vm687_vm11, %v1677_v51, %v464_v15  ;;  %v465_v46 = vsel %vm463_vm12, %v1677_v51, %v464_v15 }
  0x84   : > { %v693_v47 = vsel %vm686_vm13, %v689_v44, %v692_v40  ;;  %v469_v48 = vsel %vm462_vm14, %v465_v46, %v468_v43 }
  0x85   : > { %v694_v45 = vsel %vm460_vm15, nan, %v693_v47  ;;  %v470_v49 = vsel %vm460_vm15, nan, %v469_v48 }
  0x86   : > { %1450 = vmatmul.mubr.f32.vlgmr.msra.gmra.mxu0 %v694_v45  ;;  %1485 = vmatmul.mubr.f32.vlgmr.msra.gmra.mxu1 %v470_v49 }
  0x87   : > { %1488 = vmatpush3.msra.mxu0 %v1933_v23  ;;  %1519 = vmatprep.mubr.f32.mxu0 %v1892_v14  ;;  %v868_v23 = vld [vmem:[#allocation2 + $0x138] sm:$0xff]  ;;  %v867_v14 = vld [vmem:[#allocation2 + $0x130] sm:$0xff] }
  0x88   : > { %1489 = vmatprep.subr.mxu0 %v875_v52  ;;  %1523 = vmatpush3.msra.mxu1 %v980_v50 }
  0x89   : > { %1490 = vmatpush3.msra.mxu0 %v875_v52  ;;  %1524 = vmatprep.subr.mxu1 %v979_v62 }
  0x8a   : > { %1491 = vmatprep.subr.mxu0 %v874_v54  ;;  %1525 = vmatpush3.msra.mxu1 %v979_v62 }
  0x8b   : > { %1492 = vmatpush3.msra.mxu0 %v874_v54  ;;  %1526 = vmatprep.subr.mxu1 %v978_v63 }
  0x8c   : > { %1493 = vmatprep.subr.mxu0 %v873_v55  ;;  %1527 = vmatpush3.msra.mxu1 %v978_v63 }
  0x8d   : > { %1494 = vmatpush3.msra.mxu0 %v873_v55 }
  0x8e   : > { %1495 = vmatprep.subr.mxu0 %v872_v19 }
  0x8f   : > { %1496 = vmatpush3.msra.mxu0 %v872_v19 }
  0x90   : > { %1497 = vmatprep.subr.mxu0 %v871_v56 }
  0x91   : > { %1498 = vmatpush3.msra.mxu0 %v871_v56 }
  0x92   : > { %1499 = vmatprep.subr.mxu0 %v870_v58 }
  0x93   : > { %1500 = vmatpush3.msra.mxu0 %v870_v58 }
  0x94   : > { %1501 = vmatprep.subr.mxu0 %v869_v41 }
  0x95   : > { %1502 = vmatpush3.msra.mxu0 %v869_v41 }
  0x96   : > { %1503 = vmatprep.subr.mxu0 %v868_v23 }
  0x97   : > { %1504 = vmatpush3.msra.mxu0 %v868_v23 }
  0x98   : > { %1505 = vmatprep.subr.mxu0 %v867_v14 }
  0x99   : > { %1506 = vmatpush3.msra.mxu0 %v867_v14 }
  0x9a   : > { %1507 = vmatprep.subr.mxu0 %v866_v42 }
  0x9b   : > { %1508 = vmatpush3.msra.mxu0 %v866_v42 }
  0x9c   : > { %1509 = vmatprep.subr.mxu0 %v865_v53 }
  0x9d   : > { %1510 = vmatpush3.msra.mxu0 %v865_v53 }
  0x9e   : > { %1511 = vmatprep.subr.mxu0 %v864_v59 }
  0x9f   : > { %1512 = vmatpush3.msra.mxu0 %v864_v59 }
  0xa0   : > { %1513 = vmatprep.subr.mxu0 %v863_v60 }
  0xa1   : > { %1514 = vmatpush3.msra.mxu0 %v863_v60 }
  0xa2   : > { %1515 = vmatprep.subr.mxu0 %v862_v61 }
  0xa3   : > { %1516 = vmatpush3.msra.mxu0 %v862_v61 }
  0xa4   : > { %1517 = vmatprep.subr.mxu0 %v861_v57 }
  0xa5   : > { %1518 = vmatpush3.msra.mxu0 %v861_v57 }
  0xa6   : > { %1520 = vmatmul.mubr.f32.vlgmr.msra.gmra.mxu0 %v1897_v16  ;;  %v977_v16 = vld [vmem:[%s2131_s3 + $0x60] sm:$0xff] }
  0xa7   : > { %1528 = vmatprep.subr.mxu1 %v977_v16 }
  0xa8   : > { %1529 = vmatpush3.msra.mxu1 %v977_v16 }
  0xa9   : > { %1530 = vmatprep.subr.mxu1 %v976_v0 }
  0xaa   : > { %1531 = vmatpush3.msra.mxu1 %v976_v0 }
  0xab   : > { %1532 = vmatprep.subr.mxu1 %v975_v1 }
  0xac   : > { %1533 = vmatpush3.msra.mxu1 %v975_v1 }
  0xad   : > { %1534 = vmatprep.subr.mxu1 %v974_v3 }
  0xae   : > { %1535 = vmatpush3.msra.mxu1 %v974_v3 }
  0xaf   : > { %1536 = vmatprep.subr.mxu1 %v973_v4 }
  0xb0   : > { %1537 = vmatpush3.msra.mxu1 %v973_v4 }
  0xb1   : > { %1538 = vmatprep.subr.mxu1 %v972_v5 }
  0xb2   : > { %1539 = vmatpush3.msra.mxu1 %v972_v5 }
  0xb3   : > { %1540 = vmatprep.subr.mxu1 %v971_v6 }
  0xb4   : > { %1541 = vmatpush3.msra.mxu1 %v971_v6 }
  0xb5   : > { %1542 = vmatprep.subr.mxu1 %v970_v7 }
  0xb6   : > { %1543 = vmatpush3.msra.mxu1 %v970_v7 }
  0xb7   : > { %1544 = vmatprep.subr.mxu1 %v969_v8 }
  0xb8   : > { %1545 = vmatpush3.msra.mxu1 %v969_v8 }
  0xb9   : > { %1546 = vmatprep.subr.mxu1 %v968_v9 }
  0xba   : > { %1547 = vmatpush3.msra.mxu1 %v968_v9 }
  0xbb   : > { %1548 = vmatprep.subr.mxu1 %v967_v10 }
  0xbc   : > { %1549 = vmatpush3.msra.mxu1 %v967_v10 }
  0xbd   : > { %1550 = vmatprep.subr.mxu1 %v966_v20 }
  0xbe   : > { %1551 = vmatpush3.msra.mxu1 %v966_v20 }
  0xbf   : > { %1552 = vmatprep.subr.mxu1 %v965_v11 }
  0xc0   : > { %1553 = vmatpush3.msra.mxu1 %v965_v11 }
 0x146   : > { %v1451_v12 = vpop.f32.mrf.mxu0  ;;  %v1486_v13 = vpop.f32.mrf.mxu1 }
 0x147   : > { %v858_v21 = vadd.f32 %v1486_v13, %v1451_v12 }
 0x148   : > { %v777_v17 = vpop.f32.mrf.mxu0  ;;  %v852_v18 = vpop.f32.mrf.mxu1 }
 0x149   : > { %v853_v25 = vadd.f32 %v852_v18, %v777_v17 }
 0x166   : > { %v1521_v22 = vpop.f32.mrf.mxu0 }
 0x167   : > { %v953_v26 = vadd.f32 %v1521_v22, %v858_v21 }
 0x168   : > { %v943_v2 = vpop.f32.mrf.mxu0 }
 0x169   : > { %v952_v24 = vadd.f32 %v943_v2, %v853_v25  ;;  %v962_v28 = vadd.f32 %v1323_v27, %v953_v26 }
 0x16b   : > { %v961_v29 = vadd.f32 %v1323_v27, %v952_v24  ;;  %v964_v31 = vmax.f32 %v962_v28, 0.0 }
 0x16d   : > { %v963_v30 = vmax.f32 %v961_v29, 0.0 }
 0x16f   : > { %1554 = vmatprep.mubr.f32.mxu1 %v963_v30 }
 0x170   : > { %1555 = vmatmul.mubr.f32.vlgmr.msra.gmra.mxu1 %v964_v31 }
 0x230   : > { %v1556_v33 = vpop.f32.mrf.mxu1 }
 0x231   : > { %v1060_v34 = vadd.f32 %v1556_v33, %v1324_v32  ;;  %1072 = sbr.rel (!%p1862_p4) target bundleno = 605 (0x25d), region = 48 }
 0x232   : > { %v1054_v35 = vpop.f32.mrf.mxu1 }
 0x233   : > { %1065 = vst.msk [vmem:[%s2083_s20 + $0x8] sm:$0xff] %vm1063_vm0, %v1060_v34  ;;  %v1055_v36 = vadd.f32 %v1324_v32, %v1054_v35 }
 0x235   : > { %1064 = vst.msk [vmem:[%s2083_s20] sm:$0xff] %vm1063_vm0, %v1055_v36 }
 0x236   : > { %s2140_s18 = smov (!%p1075_p6, %s1074_s18), 2 }
 0x237   : > { %s1327_s29 = sshll.u32 %s2140_s18, 7 }
 0x238   : > { %p1330_p7 = scmp.eq.s32.totalorder %s1327_s29, 0 }
 0x239   : > { %s2100_s30 = sshrl.u32 (!%p1330_p7), %s2140_s18, 1 }
 0x23a   : > { %1083 = sbr.rel (%p1330_p7) target bundleno = 605 (0x25d), region = 52  ;;  %p1331_p4 = scmp.le.s32.totalorder (!%p1330_p7), %s2100_s30, 0 }
 0x23f   : > { %1245 = sbr.rel (%p1331_p4) target bundleno = 588 (0x24c), region = 129  ;;  %s1766_s21 = smov (!%p1331_p4), %s2094_s28  }
 0x240   : > { %s1770_s26 = smov (!%p1331_p4), %s2083_s20   ;;  %s1774_s10 = smov (!%p1331_p4), 0  }
 0x241   : > { %s1778_s6 = smov (!%p1331_p4), 0  }
 0x244 LB: >> { %v1148_v37 = vld [vmem:[%s1772_s26] sm:$0xff]  ;;  %v1150_v51 = vld [vmem:[%s1772_s26 + $0x8] sm:$0xff]  ;;  %s1152_s7 = sadd.s32 1, %s1776_s10  ;;  %s1142_s6 = sadd.s32 1, %s1780_s6   ;;  %s1780_s6 = sphi %s1778_s6, %s1142_s6   ;;  %s1776_s10 = sphi %s1774_s10, %s1775_s10   ;;  %s1772_s26 = sphi %s1770_s26, %s1157_s26   ;;  %s1768_s21 = sphi %s1766_s21, %s1158_s21  }
 0x245   : >> { %1149 = vst [vmem:[%s1768_s21] sm:$0xff] %v1148_v37  ;;  %1151 = vst [vmem:[%s1768_s21 + $0x8] sm:$0xff] %v1150_v51  ;;  %p1153_p8 = scmp.ge.s32.totalorder %s1152_s7, %s2100_s30  ;;  %p1141_p9 = scmp.ge.s32.totalorder %s1142_s6, %s2100_s30 }
 0x247   : >> { %s2142_s7 = smov (%p1153_p8, %s1152_s7), 0  ;;  %1144 = sbr.rel (!%p1141_p9) target bundleno = 580 (0x244), region = 135 }
 0x248   : >> { %s1332_s8 = sshll.u32 %s2142_s7, 4  ;;  %s1775_s10 = smov %s2142_s7  }
 0x249   : >> { %s1157_s26 = scalar_lea.vmem %s2083_s20, %s1332_s8 [#allocation4]   ;;  %s1158_s21 = scalar_lea.vmem %s2094_s28, %s1332_s8  }
 0x24c PF: > { %s2110_s9 = sand.u32 1, %s2140_s18   ;;  %s1343_s11 = sshll.u32 %s2100_s30, 4 }
 0x24d   : > { %s1163_s12 = scalar_lea.vmem %s2083_s20, %s1343_s11 [#allocation4]   ;;  %s1165_s13 = scalar_lea.vmem %s2094_s28, %s1343_s11  }
 0x24e   : > { %p1337_p10 = scmp.le.s32.totalorder %s2110_s9, 0 }
 0x24f   : > { %s1782_s14 = smov (!%p1337_p10), %s1165_s13   ;;  %s1786_s15 = smov (!%p1337_p10), %s1163_s12  }
 0x250   : > { %1259 = sbr.rel (%p1337_p10) target bundleno = 605 (0x25d), region = 140  ;;  %s1790_s16 = smov (!%p1337_p10), 0  }
 0x251   : > { %s1794_s17 = smov (!%p1337_p10), 0  }
 0x255 LB: >> { %v1175_v38 = vld [vmem:[%s1788_s15] sm:$0xff]  ;;  %s1177_s18 = sadd.s32 1, %s1792_s16  ;;  %s1169_s17 = sadd.s32 1, %s1796_s17   ;;  %s1796_s17 = sphi %s1794_s17, %s1169_s17   ;;  %s1792_s16 = sphi %s1790_s16, %s1791_s16   ;;  %s1788_s15 = sphi %s1786_s15, %s1182_s15   ;;  %s1784_s14 = sphi %s1782_s14, %s1183_s14  }
 0x256   : >> { %1176 = vst [vmem:[%s1784_s14] sm:$0xff] %v1175_v38  ;;  %p1178_p11 = scmp.ge.s32.totalorder %s1177_s18, %s2110_s9  ;;  %p1168_p12 = scmp.ge.s32.totalorder %s1169_s17, %s2110_s9 }
 0x258   : >> { %s2144_s18 = smov (%p1178_p11, %s1177_s18), 0  ;;  %1171 = sbr.rel (!%p1168_p12) target bundleno = 597 (0x255), region = 146 }
 0x259   : >> { %s1338_s20 = sshll.u32 %s2144_s18, 3  ;;  %s1791_s16 = smov %s2144_s18  }
 0x25a   : >> { %s1182_s15 = scalar_lea.vmem %s1163_s12, %s1338_s20 [#allocation4]   ;;  %s1183_s14 = scalar_lea.vmem %s1165_s13, %s1338_s20  }
 0x25d PF: > { %p13_p13 = scmp.ge.s32.totalorder %s1852_s22, 5   ;;  %s2136_s18 = smov %s1760_s19 }
 0x25e   : > { %s2137_s19 = smov %s1860_s25  ;;  %s2138_s20 = smov %s1852_s22 }
 0x25f   :  { %15 = sbr.rel (!%p13_p13) target bundleno = 2 (0x2), region = 157 }
 0x264   :  { %1199 = vsyncpa [#allocation3], 1 }
 0x265   :  { %1201 = vsyncpa [#allocation3 + $0x1], 1 }

</bundles_post_ra>
